<compile_context>
chip_gen: v6e
topology: v6e:2x2x1
jax: 0.10.0
libtpu: 0.0.40
codegen_flags: <defaults>
</compile_context>

<pallas_src>
import jax
import jax.numpy as jnp
from jax import lax
from jax.experimental import pallas as pl
from jax.experimental.pallas import tpu as pltpu


def _make_kernel(pool2, nbphw):
    def kernel(x_ref, w_ref, scale_ref, shift_ref, o_ref):
        # x_ref:     (1, POOL2*NB*PH*PW, KKC)  bf16 corner-grouped im2col patches
        # w_ref:     (KKC, COUTP)              bf16 raw conv weights (no BN fold)
        # scale_ref: (1, COUTP)                f32  gamma / sqrt(running_var+eps)
        # shift_ref: (1, COUTP)                f32  beta + (conv_bias-mean)*scale
        # o_ref:     (1, NB*PH*PW, COUTP)      bf16 pooled output
        # One MXU matmul over all 4 pooling corners (amortizes fill/drain).
        acc = jnp.dot(x_ref[0], w_ref[...], preferred_element_type=jnp.float32)
        # BN scale in f32 on the accumulator, BEFORE the pooling max so that a
        # negative gamma keeps exact max-pool semantics.
        acc = acc * scale_ref[...]
        # MaxPool2d(2): elementwise max over the corner row-blocks (pure VPU).
        p = acc[:nbphw]
        for k in range(1, pool2):
            p = jnp.maximum(p, acc[k * nbphw:(k + 1) * nbphw])
        # BN shift + ReLU, hoisted out of the corner loop (both commute w/ max).
        o_ref[0] = jnp.maximum(p + shift_ref[...], 0.0).astype(o_ref.dtype)

    return kernel


def _vmem_bytes_per_step(nb, phw, pool2, kkc, coutp):
    """Rough double-buffered VMEM working-set estimate for one grid step."""
    kkc_v = ((kkc + 127) // 128) * 128          # lane padding inside VMEM
    m = pool2 * nb * phw
    patches = 2 * m * kkc_v * 2                 # 2 pipeline buffers, bf16
    weights = 2 * kkc_v * coutp * 2
    scales = 4 * coutp * 4
    out = 2 * nb * phw * coutp * 2              # 2 pipeline buffers, bf16
    temps = (m + nb * phw) * coutp * 4          # f32 matmul result + pooled temp
    return patches + weights + scales + out + temps


def _pick_batch_tile(n, batch_tile, phw, pool2, kkc, coutp, budget):
    """Largest NB that divides N (no padded-batch waste), keeps >= 2 grid
    steps when N >= 2 (feeds both TensorCores on v7x), and fits the VMEM
    budget (safe for v7x's 64 MiB physical VMEM)."""
    cap = max(1, min(batch_tile, n // 2 if n >= 2 else 1))
    for nb in range(cap, 0, -1):
        if n % nb == 0 and _vmem_bytes_per_step(nb, phw, pool2, kkc, coutp) <= budget:
            return nb
    return 1


def conv2d_layer_forward(x_nchw, weight_oihw, conv_bias, gamma, beta,
                         running_mean, running_var, *, eps=1e-5, pooling=2,
                         batch_tile=32):
    N, CIN, H, W = x_nchw.shape
    COUT, CIN_w, K, K2 = weight_oihw.shape
    assert CIN_w == CIN and K == K2
    assert K % 2 == 1, "padding=K//2 is exact SAME padding only for odd K"
    assert H % pooling == 0 and W % pooling == 0
    pad = K // 2
    PH, PW = H // pooling, W // pooling
    PHW = PH * PW
    POOL2 = pooling * pooling
    KKC = K * K * CIN
    COUTP = ((COUT + 127) // 128) * 128          # lane-dense channel padding

    VMEM_BUDGET = 40 * 1024 * 1024
    NB = _pick_batch_tile(N, batch_tile, PHW, POOL2, KKC, COUTP, VMEM_BUDGET)
    NGRID = N // NB                               # NB always divides N
    NBPHW = NB * PHW

    # ---------------- glue (plain JAX, all bf16): layout & im2col -------------
    x_nhwc = jnp.transpose(x_nchw, (0, 2, 3, 1)).astype(jnp.bfloat16)
    xp = jnp.pad(x_nhwc, ((0, 0), (pad, pad), (pad, pad), (0, 0)))

    # im2col: (N, H, W, K*K*CIN); tap-major then channel (matches w_mat below)
    patches = jnp.concatenate(
        [xp[:, dy:dy + H, dx:dx + W, :] for dy in range(K) for dx in range(K)],
        axis=-1)
    # regroup rows by pooling-window corner so the in-kernel pool is pure VPU max
    pc = patches.reshape(N, PH, pooling, PW, pooling, KKC)
    pc = jnp.transpose(pc, (0, 2, 4, 1, 3, 5)).reshape(N, POOL2, PHW, KKC)
    pc = pc.reshape(NGRID, NB, POOL2, PHW, KKC)
    pc = jnp.transpose(pc, (0, 2, 1, 3, 4)).reshape(NGRID, POOL2 * NBPHW, KKC)
    # TODO(synk): for production CIN (>=32), build the patches in-kernel from a
    # halo NHWC tile (full-block / pl.ANY BlockSpec + in-kernel taps) to remove
    # the 9x patch-materialization HBM traffic entirely.

    # raw conv weights (BN scale NOT folded -> tighter bf16 accuracy):
    # OIHW -> (K*K*CIN, COUT), padded to COUTP lanes, bf16
    w_mat = jnp.transpose(weight_oihw, (2, 3, 1, 0)).reshape(KKC, COUT)
    w_mat = jnp.pad(w_mat, ((0, 0), (0, COUTP - COUT))).astype(jnp.bfloat16)

    # BN (eval) parameters as f32 per-channel scale / shift (conv bias folded
    # into the shift):  y = scale*conv + [beta + (conv_bias - mean)*scale]
    scale = (gamma / jnp.sqrt(running_var + eps)).astype(jnp.float32)
    shift = (beta + (conv_bias - running_mean) * scale).astype(jnp.float32)
    scale_p = jnp.pad(scale, (0, COUTP - COUT)).reshape(1, COUTP)
    shift_p = jnp.pad(shift, (0, COUTP - COUT)).reshape(1, COUTP)

    est = _vmem_bytes_per_step(NB, PHW, POOL2, KKC, COUTP)
    vmem_limit = int(min(56 * 1024 * 1024, max(32 * 1024 * 1024, 1.3 * est)))

    kernel = _make_kernel(POOL2, NBPHW)
    out = pl.pallas_call(
        kernel,
        out_shape=jax.ShapeDtypeStruct((NGRID, NBPHW, COUTP), jnp.bfloat16),
        grid=(NGRID,),
        in_specs=[
            pl.BlockSpec((1, POOL2 * NBPHW, KKC), lambda g: (g, 0, 0)),
            pl.BlockSpec((KKC, COUTP), lambda g: (0, 0)),
            pl.BlockSpec((1, COUTP), lambda g: (0, 0)),
            pl.BlockSpec((1, COUTP), lambda g: (0, 0)),
        ],
        out_specs=pl.BlockSpec((1, NBPHW, COUTP), lambda g: (g, 0, 0)),
        compiler_params=pltpu.CompilerParams(
            dimension_semantics=("parallel",),
            vmem_limit_bytes=vmem_limit),
    )(pc, w_mat, scale_p, shift_p)

    # un-pad channels, back to NCHW, restore f32 on the tiny sliced tensor
    # TODO(synk): when COUT << 128 a lane-packed (PW*COUT) output layout would
    # cut the padded writeback further; the COUTP scheme is right for COUT>=64.
    out = out.reshape(N, PH, PW, COUTP)[:, :, :, :COUT]
    out = jnp.transpose(out, (0, 3, 1, 2)).astype(jnp.float32)
    return out


if __name__ == "__main__":
    N, CIN, COUT, H, W, K = 2, 4, 8, 16, 16, 3
    EPS = 1e-5

    key = jax.random.PRNGKey(0)
    ks = jax.random.split(key, 7)
    x = jax.random.normal(ks[0], (N, CIN, H, W), jnp.float32)
    weight = 0.1 * jax.random.normal(ks[1], (COUT, CIN, K, K), jnp.float32)
    conv_bias = 0.1 * jax.random.normal(ks[2], (COUT,), jnp.float32)
    gamma = 1.0 + 0.1 * jax.random.normal(ks[3], (COUT,), jnp.float32)
    beta = 0.1 * jax.random.normal(ks[4], (COUT,), jnp.float32)
    running_mean = 0.1 * jax.random.normal(ks[5], (COUT,), jnp.float32)
    running_var = jnp.abs(1.0 + 0.1 * jax.random.normal(ks[6], (COUT,), jnp.float32))

    out = conv2d_layer_forward(x, weight, conv_bias, gamma, beta,
                               running_mean, running_var, eps=EPS, pooling=2)
    out = jax.block_until_ready(out)

    # pure-JAX f32 reference (eval-mode forward of the PyTorch module)
    conv = lax.conv_general_dilated(
        x, weight, window_strides=(1, 1), padding="SAME",
        dimension_numbers=("NCHW", "OIHW", "NCHW"))
    conv = conv + conv_bias[None, :, None, None]
    bn = ((conv - running_mean[None, :, None, None])
          / jnp.sqrt(running_var[None, :, None, None] + EPS)
          * gamma[None, :, None, None] + beta[None, :, None, None])
    relu = jnp.maximum(bn, 0.0)
    ref = lax.reduce_window(relu, -jnp.inf, lax.max,
                            (1, 1, 2, 2), (1, 1, 2, 2), "VALID")

    assert out.shape == ref.shape == (N, COUT, H // 2, W // 2)
    err = float(jnp.max(jnp.abs(out - ref)))
    # matmul operands and the kernel output are bf16 (f32 accumulation)
    assert err < 5e-2, f"max abs err {err}"
    print("KERNEL_OK")
</pallas_src>

<mosaic_0001>
module attributes {stable_mosaic.version = 11 : i64} {
  func.func @kernel(%arg0: i32, %arg1: memref<1x256x36xbf16, #tpu.memory_space<vmem>>, %arg2: memref<36x128xbf16, #tpu.memory_space<vmem>>, %arg3: memref<1x128xf32, #tpu.memory_space<vmem>>, %arg4: memref<1x128xf32, #tpu.memory_space<vmem>>, %arg5: memref<1x64x128xbf16, #tpu.memory_space<vmem>>) attributes {dimension_semantics = [#tpu.dimension_semantics<parallel>], iteration_bounds = array<i64: 2>, scalar_prefetch = 0 : i64, scratch_operands = 0 : i64, tpu.core_type = #tpu.core_type<tc>, window_params = [{transform_indices = @transform_0, window_bounds = array<i64: 1, 256, 36>}, {pipeline_mode = #tpu.pipeline_mode<synchronous>, transform_indices = @transform_1, window_bounds = array<i64: 36, 128>}, {pipeline_mode = #tpu.pipeline_mode<synchronous>, transform_indices = @transform_2, window_bounds = array<i64: 1, 128>}, {pipeline_mode = #tpu.pipeline_mode<synchronous>, transform_indices = @transform_3, window_bounds = array<i64: 1, 128>}, {transform_indices = @transform_4, window_bounds = array<i64: 1, 64, 128>}]} {
    %c0 = arith.constant 0 : index
    %c0_0 = arith.constant 0 : index
    %c0_1 = arith.constant 0 : index
    %0 = vector.load %arg1[%c0, %c0_0, %c0_1] : memref<1x256x36xbf16, #tpu.memory_space<vmem>>, vector<1x256x36xbf16>
    %1 = vector.shape_cast %0 : vector<1x256x36xbf16> to vector<256x36xbf16>
    %c0_2 = arith.constant 0 : index
    %c0_3 = arith.constant 0 : index
    %2 = vector.load %arg2[%c0_2, %c0_3] : memref<36x128xbf16, #tpu.memory_space<vmem>>, vector<36x128xbf16>
    %cst = arith.constant dense<0.000000e+00> : vector<256x128xf32>
    %3 = tpu.matmul %1, %2, %cst {dimension_numbers = #tpu.dot_dimension_numbers<[1], [0], [0], [1], [0, 0, 1, 1], [], []>} : vector<256x36xbf16>, vector<36x128xbf16>, vector<256x128xf32> -> vector<256x128xf32>
    %c0_4 = arith.constant 0 : index
    %c0_5 = arith.constant 0 : index
    %4 = vector.load %arg3[%c0_4, %c0_5] : memref<1x128xf32, #tpu.memory_space<vmem>>, vector<1x128xf32>
    %5 = vector.broadcast %4 : vector<1x128xf32> to vector<256x128xf32>
    %6 = arith.mulf %3, %5 : vector<256x128xf32>
    %7 = vector.extract_strided_slice %6 {offsets = [0, 0], sizes = [64, 128], strides = [1, 1]} : vector<256x128xf32> to vector<64x128xf32>
    %8 = vector.extract_strided_slice %6 {offsets = [64, 0], sizes = [64, 128], strides = [1, 1]} : vector<256x128xf32> to vector<64x128xf32>
    %9 = arith.maximumf %7, %8 : vector<64x128xf32>
    %10 = vector.extract_strided_slice %6 {offsets = [128, 0], sizes = [64, 128], strides = [1, 1]} : vector<256x128xf32> to vector<64x128xf32>
    %11 = arith.maximumf %9, %10 : vector<64x128xf32>
    %12 = vector.extract_strided_slice %6 {offsets = [192, 0], sizes = [64, 128], strides = [1, 1]} : vector<256x128xf32> to vector<64x128xf32>
    %13 = arith.maximumf %11, %12 : vector<64x128xf32>
    %c0_6 = arith.constant 0 : index
    %c0_7 = arith.constant 0 : index
    %14 = vector.load %arg4[%c0_6, %c0_7] : memref<1x128xf32, #tpu.memory_space<vmem>>, vector<1x128xf32>
    %15 = vector.broadcast %14 : vector<1x128xf32> to vector<64x128xf32>
    %16 = arith.addf %13, %15 : vector<64x128xf32>
    %cst_8 = arith.constant 0.000000e+00 : f32
    %17 = vector.broadcast %cst_8 : f32 to vector<64x128xf32>
    %18 = arith.maximumf %16, %17 : vector<64x128xf32>
    %19 = arith.truncf %18 : vector<64x128xf32> to vector<64x128xbf16>
    %c0_9 = arith.constant 0 : index
    %c0_10 = arith.constant 0 : index
    %c0_11 = arith.constant 0 : index
    %20 = vector.load %arg5[%c0_9, %c0_10, %c0_11] : memref<1x64x128xbf16, #tpu.memory_space<vmem>>, vector<1x64x128xbf16>
    %21 = vector.shape_cast %20 : vector<1x64x128xbf16> to vector<64x128xbf16>
    %22 = vector.shape_cast %19 : vector<64x128xbf16> to vector<1x64x128xbf16>
    tpu.vector_store %arg5[%c0_9, %c0_10, %c0_11], %22 {strides = array<i32>} : memref<1x64x128xbf16, #tpu.memory_space<vmem>>, vector<1x64x128xbf16>,
    return
  }
  func.func @transform_0(%arg0: i32) -> (i32, i32, i32) {
    %c0_i32 = arith.constant 0 : i32
    %c0_i32_0 = arith.constant 0 : i32
    %c0_i32_1 = arith.constant 0 : i32
    return %arg0, %c0_i32, %c0_i32_0 : i32, i32, i32
  }
  func.func @transform_1(%arg0: i32) -> (i32, i32) {
    %c0_i32 = arith.constant 0 : i32
    %c0_i32_0 = arith.constant 0 : i32
    %c0_i32_1 = arith.constant 0 : i32
    return %c0_i32, %c0_i32_0 : i32, i32
  }
  func.func @transform_2(%arg0: i32) -> (i32, i32) {
    %c0_i32 = arith.constant 0 : i32
    %c0_i32_0 = arith.constant 0 : i32
    %c0_i32_1 = arith.constant 0 : i32
    return %c0_i32, %c0_i32_0 : i32, i32
  }
  func.func @transform_3(%arg0: i32) -> (i32, i32) {
    %c0_i32 = arith.constant 0 : i32
    %c0_i32_0 = arith.constant 0 : i32
    %c0_i32_1 = arith.constant 0 : i32
    return %c0_i32, %c0_i32_0 : i32, i32
  }
  func.func @transform_4(%arg0: i32) -> (i32, i32, i32) {
    %c0_i32 = arith.constant 0 : i32
    %c0_i32_0 = arith.constant 0 : i32
    %c0_i32_1 = arith.constant 0 : i32
    return %arg0, %c0_i32, %c0_i32_0 : i32, i32, i32
  }
}

</mosaic_0001>

<bundles_post_ra>
// kernel: tpu_custom_call.1
= control target key start
LH: loop header
LB: loop body
LE: loop exit
PB: predicated region body
PF: predicated region fallthrough
CT: control target
= control target key end

     0   :  { %9 = vsyncpa [#allocation3], 0  ;;  %s1249_s0 = inlined_call_operand.vmem [shape: bf16[2,256,36], index: 0, kind: input, shape index: {}]   ;;  %s1250_s1 = inlined_call_operand.vmem [shape: bf16[36,128], index: 1, kind: input, shape index: {}]   ;;  %s1251_s2 = inlined_call_operand.vmem [shape: f32[1,128], index: 2, kind: input, shape index: {}]   ;;  %s1252_s3 = inlined_call_operand.vmem [shape: f32[1,128], index: 3, kind: input, shape index: {}]   ;;  %s1253_s4 = inlined_call_operand.hbm [shape: bf16[2,64,128], index: 4, kind: output, shape index: {}]  }
   0x1   :  { %11 = vsyncpa [#allocation3 + $0x1], 0  ;;  %s1050_s15 = smov 0   ;;  %s1052_s16 = smov 0  }
   0x2   :  { %s1054_s17 = smov 0   ;;  %s1056_s18 = smov 0  }
   0x3 LB: > { %s1071_s19 = sadd.s32 4294967295, %s1020_s18   ;;  %s745_s20 = sadd.s32 4294967294, %s1020_s18   ;;  %s1020_s18 = sphi %s1056_s18, %s1259_s18   ;;  %s1016_s17 = sphi %s1054_s17, %s1258_s17   ;;  %s1012_s16 = sphi %s1052_s16, %s1257_s16   ;;  %s1008_s15 = sphi %s1050_s15, %s1256_s15  }
   0x4   : > { %s1075_s21 = sadd.s32 1, %s1020_s18   ;;  %s113_s22 = sadd.s32 1, %s1016_s17 }
   0x5   : > { %s110_s23 = ssub.s32 %s1020_s18, %s1075_s21  ;;  %p123_p0 = scmp.ne.s32.totalorder %s1016_s17, %s1012_s16 }
   0x6   : > { %p111_p1 = scmp.eq.s32.totalorder %s110_s23, 0  ;;  %p124_p2 = scmp.eq.s32.totalorder %s1071_s19, 1 }
   0x7   : > { %p129_p3 = scmp.ne.s32.totalorder %s1012_s16, %s1008_s15  ;;  %p130_p4 = scmp.eq.s32.totalorder %s745_s20, 1 }
   0x8   : > { %s1086_s24 = scalar_select %p111_p1, %s1016_s17, %s113_s22  }
   0x9   : > { %p1088_p5 = por %p124_p2, %p123_p0  ;;  %p1092_p6 = por %p130_p4, %p129_p3 }
   0xa   : > { %p748_p7 = scmp.ge.s32.totalorder %s1020_s18, 1  ;;  %p165_p8 = scmp.lt.s32.totalorder %s1020_s18, 3 }
   0xc   : > { %p166_p9 = pnand %p748_p7, %p165_p8 }
   0xd   : > { %p191_p10 = scmp.lt.s32.totalorder (!%p166_p9), %s1071_s19, 1  ;;  %s188_s22 = sand.u32 (!%p166_p9), 1, %s1012_s16  }
   0xe   : > { %169 = sbr.rel (%p166_p9) target bundleno = 283 (0x11b), region = 36  ;;  %s749_s23 = sshll.u32 (!%p166_p9), %s188_s22, 5 }
   0xf   : > { %s190_s27 = scalar_lea.vmem (!%p166_p9), [#allocation2], %s749_s23  ;;  %s811_s28 = sshll.u32 (!%p166_p9), %s1071_s19, 9 }
  0x10   : > { %s683_s29 = sshll.u32 (!%p166_p9), %s190_s27, 4  ;;  %s1203_s6 = scalar_lea.hbm (!%p166_p9), %s1253_s4, %s811_s28  ;;  %s1205_s29 = int_to_ptr.vmem [resolvable:$true] %s683_s29 }
  0x11   : > { %s1209_s7 = scalar_lea.sflag (!%p166_p9), [#allocation3], %s188_s22 }
  0x13   : > { %v941_v0 = vld [vmem:[%s1250_s1 + $0x10] ss:$0 sps:$4 sm:$0x33]   ;;  %vm378_vm0 = vcmask 1041408   ;;  %v942_v1 = vld [vmem:[%s1250_s1 + $0x8] sm:$0xff]   ;;  %s192_s5 = scalar_select %p191_p10, %s1071_s19, 1 }
  0x14   : > { %898 = vmatprep.subr.msk.bf16.mxu0 %vm378_vm0, %v941_v0  ;;  %899 = vmatprep.subr.msk.bf16.mxu1 %vm378_vm0, %v941_v0  ;;  %v380_v2 = vsel %vm378_vm0, %v941_v0, 0  ;;  %v943_v3 = vld [vmem:[%s1250_s1] sm:$0xff]   ;;  %vm329_vm1 = vcmask 293888   ;;  %s960_s19 = scalar_lea.vmem %s1205_s29, 512 }
  0x15   : > { %855 = vmatpush3.bf16.msra.mxu0 %v380_v2  ;;  %895 = vmatpush3.bf16.msra.mxu1 %v380_v2  ;;  %s802_s8 = sshll.u32 %s192_s5, 7  ;;  %v1149_v34 = vld [vmem:[%s1251_s2] ss:$0 sm:$0xff]  ;;  %p961_p11 = scmp.ne.s32.totalorder %s1205_s29, %s960_s19 }
  0x16   : > { %856 = vmatprep.subr.bf16.mxu0 %v942_v1  ;;  %893 = vmatprep.subr.bf16.mxu1 %v942_v1  ;;  %s1112_s11 = scalar_lea.vmem %s1249_s0, %s802_s8  ;;  %v1167_v62 = vld [vmem:[%s1252_s3] ss:$0 sm:$0xff]  ;;  %s1022_s8 = smov [#allocation2]  }
  0x17   : > { %v944_v4 = vld [vmem:[%s1112_s11] sm:$0xff]   ;;  %v946_v6 = vld [vmem:[%s1112_s11 + $0x8] sm:$0xff]   ;;  %v948_v8 = vld [vmem:[%s1112_s11 + $0x10] sm:$0xff]   ;;  %p962_p12 = pnand %p961_p11, %p1088_p5  ;;  %s964_s9 = sshll.u32 %s1022_s8, 4  ;;  %s965_s9 = int_to_ptr.vmem [resolvable:$false] %s964_s9 }
  0x18   : > { %v945_v5 = vld [vmem:[%s1112_s11 + $0x40] sm:$0xff]   ;;  %860 = vmatprep.mubr.msk.bf16.mxu0 %vm329_vm1, %v944_v4  ;;  %v947_v7 = vld [vmem:[%s1112_s11 + $0x48] sm:$0xff]   ;;  %v949_v9 = vld [vmem:[%s1112_s11 + $0x50] sm:$0xff]   ;;  %s966_s10 = scalar_lea.vmem %s965_s9, 1024  ;;  %p967_p0 = scmp.lt.s32.totalorder %s1205_s29, %s965_s9 }
  0x19   : > { %857 = vmatpush3.bf16.msra.mxu0 %v942_v1  ;;  %896 = vmatpush3.bf16.msra.mxu1 %v942_v1  ;;  %v950_v10 = vld [vmem:[%s1112_s11 + $0x18] sm:$0xff]   ;;  %v952_v12 = vld [vmem:[%s1112_s11 + $0x20] sm:$0xff]   ;;  %v954_v14 = vld [vmem:[%s1112_s11 + $0x28] sm:$0xff]   ;;  %p963_p13 = pneg %p962_p12  ;;  %p968_p1 = scmp.lt.s32.totalorder %s966_s10, %s960_s19 }
  0x1a   : > { %858 = vmatprep.subr.bf16.mxu0 %v943_v3  ;;  %894 = vmatprep.subr.bf16.mxu1 %v943_v3  ;;  %v951_v11 = vld [vmem:[%s1112_s11 + $0x58] sm:$0xff]   ;;  %v953_v13 = vld [vmem:[%s1112_s11 + $0x60] sm:$0xff]   ;;  %v955_v15 = vld [vmem:[%s1112_s11 + $0x68] sm:$0xff]  }
  0x1b   : > { %876 = vmatprep.mubr.msk.bf16.mxu1 %vm329_vm1, %v945_v5  ;;  %v956_v16 = vld [vmem:[%s1112_s11 + $0x30] sm:$0xff]   ;;  %v958_v18 = vld [vmem:[%s1112_s11 + $0x38] sm:$0xff]   ;;  %p969_p2 = por %p968_p1, %p967_p0 }
  0x1c   : > { %v957_v17 = vld [vmem:[%s1112_s11 + $0x70] sm:$0xff]   ;;  %v959_v19 = vld [vmem:[%s1112_s11 + $0x78] sm:$0xff]  }
  0x1d   : > { %859 = vmatpush3.bf16.msra.mxu0 %v943_v3  ;;  %897 = vmatpush3.bf16.msra.mxu1 %v943_v3  ;;  %p970_p3 = pnand %p969_p2, %p963_p13 }
  0x20   : > { %861 = vmatmul.mubr.msk.bf16.vlgmr.msra.gmra.mxu0 %vm329_vm1, %v946_v6  ;;  %877 = vmatmul.mubr.msk.bf16.vlgmr.msra.gmra.mxu1 %vm329_vm1, %v947_v7 }
  0x21   : > { %864 = vmatprep.mubr.msk.bf16.mxu0 %vm329_vm1, %v948_v8  ;;  %880 = vmatprep.mubr.msk.bf16.mxu1 %vm329_vm1, %v949_v9 }
  0x28   : > { %865 = vmatmul.mubr.msk.bf16.gmra.mxu0 %vm329_vm1, %v950_v10  ;;  %881 = vmatmul.mubr.msk.bf16.gmra.mxu1 %vm329_vm1, %v951_v11 }
  0x29   : > { %868 = vmatprep.mubr.msk.bf16.mxu0 %vm329_vm1, %v952_v12  ;;  %884 = vmatprep.mubr.msk.bf16.mxu1 %vm329_vm1, %v953_v13 }
  0x30   : > { %869 = vmatmul.mubr.msk.bf16.gmra.mxu0 %vm329_vm1, %v954_v14  ;;  %885 = vmatmul.mubr.msk.bf16.gmra.mxu1 %vm329_vm1, %v955_v15 }
  0x31   : > { %872 = vmatprep.mubr.msk.bf16.mxu0 %vm329_vm1, %v956_v16  ;;  %888 = vmatprep.mubr.msk.bf16.mxu1 %vm329_vm1, %v957_v17 }
  0x38   : > { %873 = vmatmul.mubr.msk.bf16.gmra.mxu0 %vm329_vm1, %v958_v18  ;;  %889 = vmatmul.mubr.msk.bf16.gmra.mxu1 %vm329_vm1, %v959_v19 }
  0xe0   : > { %v862_v20 = vpop.f32.mrf.mxu0  ;;  %v878_v21 = vpop.f32.mrf.mxu1 }
  0xe1   : > { %v552_v39 = vmul.f32 %v862_v20, %v1149_v34  ;;  %v568_v41 = vmul.f32 %v878_v21, %v1149_v34 }
  0xe2   : > { %v416_v22 = vpop.f32.mrf.mxu0  ;;  %v480_v23 = vpop.f32.mrf.mxu1 }
  0xe3   : > { %v550_v44 = vmul.f32 %v1149_v34, %v416_v22  ;;  %v566_v48 = vmul.f32 %v1149_v34, %v480_v23 }
  0xe4   : > { %v863_v24 = vpop.f32.mrf.mxu0  ;;  %v879_v25 = vpop.f32.mrf.mxu1 }
  0xe5   : > { %v553_v51 = vmul.f32 %v863_v24, %v1149_v34  ;;  %v569_v55 = vmul.f32 %v879_v25, %v1149_v34 }
  0xe6   : > { %v419_v26 = vpop.f32.mrf.mxu0  ;;  %v483_v27 = vpop.f32.mrf.mxu1 }
  0xe7   : > { %v551_v56 = vmul.f32 %v1149_v34, %v419_v26  ;;  %v567_v57 = vmul.f32 %v1149_v34, %v483_v27 }
  0xe8   : > { %v866_v28 = vpop.f32.mrf.mxu0  ;;  %v882_v29 = vpop.f32.mrf.mxu1 }
  0xe9   : > { %v556_v2 = vmul.f32 %v866_v28, %v1149_v34  ;;  %v572_v3 = vmul.f32 %v882_v29, %v1149_v34 }
  0xea   : > { %v432_v30 = vpop.f32.mrf.mxu0  ;;  %v496_v31 = vpop.f32.mrf.mxu1 }
  0xeb   : > { %v554_v4 = vmul.f32 %v1149_v34, %v432_v30  ;;  %v570_v5 = vmul.f32 %v1149_v34, %v496_v31 }
  0xec   : > { %v867_v32 = vpop.f32.mrf.mxu0  ;;  %v883_v33 = vpop.f32.mrf.mxu1 }
  0xed   : > { %v557_v12 = vmul.f32 %v867_v32, %v1149_v34  ;;  %v573_v13 = vmul.f32 %v883_v33, %v1149_v34 }
  0xee   : > { %v435_v35 = vpop.f32.mrf.mxu0  ;;  %v499_v36 = vpop.f32.mrf.mxu1 }
  0xef   : > { %v555_v18 = vmul.f32 %v1149_v34, %v435_v35  ;;  %v571_v28 = vmul.f32 %v1149_v34, %v499_v36 }
  0xf0   : > { %v870_v37 = vpop.f32.mrf.mxu0  ;;  %v886_v38 = vpop.f32.mrf.mxu1 }
  0xf1   : > { %v560_v40 = vmul.f32 %v870_v37, %v1149_v34  ;;  %v576_v46 = vmul.f32 %v886_v38, %v1149_v34 }
  0xf2   : > { %v448_v42 = vpop.f32.mrf.mxu0  ;;  %v512_v43 = vpop.f32.mrf.mxu1 }
  0xf3   : > { %v584_v45 = vmax.f32 %v552_v39, %v560_v40  ;;  %v558_v47 = vmul.f32 %v1149_v34, %v448_v42  ;;  %v574_v58 = vmul.f32 %v1149_v34, %v512_v43 }
  0xf4   : > { %v871_v49 = vpop.f32.mrf.mxu0  ;;  %v887_v50 = vpop.f32.mrf.mxu1 }
  0xf5   : > { %v592_v52 = vmax.f32 %v584_v45, %v568_v41  ;;  %v582_v53 = vmax.f32 %v550_v44, %v558_v47  ;;  %v561_v54 = vmul.f32 %v871_v49, %v1149_v34  ;;  %v577_v9 = vmul.f32 %v887_v50, %v1149_v34 }
  0xf6   : > { %v451_v59 = vpop.f32.mrf.mxu0  ;;  %v515_v60 = vpop.f32.mrf.mxu1 }
  0xf7   : > { %v600_v61 = vmax.f32 %v592_v52, %v576_v46  ;;  %v590_v63 = vmax.f32 %v582_v53, %v566_v48  ;;  %v585_v0 = vmax.f32 %v553_v51, %v561_v54  ;;  %v559_v1 = vmul.f32 %v1149_v34, %v451_v59 }
  0xf8   : > { %v874_v6 = vpop.f32.mrf.mxu0  ;;  %v890_v7 = vpop.f32.mrf.mxu1  ;;  %v575_v20 = vmul.f32 %v1149_v34, %v515_v60 }
  0xf9   : > { %v598_v8 = vmax.f32 %v590_v63, %v574_v58  ;;  %v593_v10 = vmax.f32 %v585_v0, %v569_v55  ;;  %v583_v11 = vmax.f32 %v551_v56, %v559_v1  ;;  %v615_v14 = vadd.f32 %v1167_v62, %v600_v61 }
  0xfa   : > { %v564_v15 = vmul.f32 %v874_v6, %v1149_v34  ;;  %v464_v16 = vpop.f32.mrf.mxu0  ;;  %v528_v17 = vpop.f32.mrf.mxu1  ;;  %v580_v24 = vmul.f32 %v890_v7, %v1149_v34 }
  0xfb   : > { %v601_v19 = vmax.f32 %v593_v10, %v577_v9  ;;  %v591_v21 = vmax.f32 %v583_v11, %v567_v57  ;;  %v613_v22 = vadd.f32 %v1167_v62, %v598_v8  ;;  %v562_v25 = vmul.f32 %v1149_v34, %v464_v16 }
  0xfc   : > { %v588_v23 = vmax.f32 %v556_v2, %v564_v15  ;;  %v875_v26 = vpop.f32.mrf.mxu0  ;;  %v891_v27 = vpop.f32.mrf.mxu1  ;;  %v623_v32 = vmax.f32 %v615_v14, 0.0  ;;  %v578_v37 = vmul.f32 %v1149_v34, %v528_v17 }
  0xfd   : > { %v616_v29 = vadd.f32 %v1167_v62, %v601_v19  ;;  %v599_v30 = vmax.f32 %v591_v21, %v575_v20  ;;  %v565_v31 = vmul.f32 %v875_v26, %v1149_v34  ;;  %v586_v35 = vmax.f32 %v554_v4, %v562_v25 }
  0xfe   : > { %v596_v33 = vmax.f32 %v588_v23, %v572_v3  ;;  %v467_v38 = vpop.f32.mrf.mxu0  ;;  %v531_v36 = vpop.f32.mrf.mxu1  ;;  %v621_v43 = vmax.f32 %v613_v22, 0.0  ;;  %v581_v46 = vmul.f32 %v891_v27, %v1149_v34 }
  0xff   : > { %v624_v39 = vmax.f32 %v616_v29, 0.0  ;;  %v614_v40 = vadd.f32 %v1167_v62, %v599_v30  ;;  %v589_v41 = vmax.f32 %v557_v12, %v565_v31  ;;  %v563_v42 = vmul.f32 %v1149_v34, %v467_v38 }
 0x100   : > { %v604_v44 = vmax.f32 %v596_v33, %v580_v24  ;;  %v594_v45 = vmax.f32 %v586_v35, %v570_v5  ;;  %v579_v52 = vmul.f32 %v1149_v34, %v531_v36 }
 0x101   : > { %v820_v47 = vpack.c.bf16 %v624_v39, %v623_v32  ;;  %v622_v48 = vmax.f32 %v614_v40, 0.0  ;;  %v597_v49 = vmax.f32 %v589_v41, %v573_v13  ;;  %v587_v50 = vmax.f32 %v555_v18, %v563_v42 }
 0x102   : > { %v602_v51 = vmax.f32 %v594_v45, %v578_v37  ;;  %v619_v54 = vadd.f32 %v1167_v62, %v604_v44 }
 0x103   : > { %832 = vst [vmem:[%s190_s27 + $0x8] sm:$0xff] %v820_v47   ;;  %v815_v53 = vpack.c.bf16 %v622_v48, %v621_v43  ;;  %v605_v55 = vmax.f32 %v597_v49, %v581_v46  ;;  %v595_v56 = vmax.f32 %v587_v50, %v571_v28 }
 0x104   : > { %v617_v57 = vadd.f32 %v1167_v62, %v602_v51  ;;  %v627_v60 = vmax.f32 %v619_v54, 0.0 }
 0x105   : > { %816 = vst [vmem:[%s190_s27] sm:$0xff] %v815_v53   ;;  %v620_v58 = vadd.f32 %v1167_v62, %v605_v55  ;;  %v603_v59 = vmax.f32 %v595_v56, %v579_v52 }
 0x106   : > { %v625_v34 = vmax.f32 %v617_v57, 0.0 }
 0x107   : > { %v628_v61 = vmax.f32 %v620_v58, 0.0  ;;  %v618_v63 = vadd.f32 %v1167_v62, %v603_v59 }
 0x109   : > { %v830_v0 = vpack.c.bf16 %v628_v61, %v627_v60  ;;  %v626_v1 = vmax.f32 %v618_v63, 0.0 }
 0x10b   : > { %834 = vst [vmem:[%s190_s27 + $0x18] sm:$0xff] %v830_v0   ;;  %v825_v2 = vpack.c.bf16 %v626_v1, %v625_v34 }
 0x10d   : > { %833 = vst [vmem:[%s190_s27 + $0x10] sm:$0xff] %v825_v2  }
 0x10e   : > { %973 = shalt.err (!%p970_p3)
}
 0x10f   : > { %s974_s11 = scalar_lea.hbm %s1203_s6, 512  ;;  %s978_s14 = scalar_lea.hbm %s1253_s4, 1024 }
 0x110   : > { %p975_p4 = scmp.ne.s32.totalorder %s1203_s6, %s974_s11  ;;  %p979_p9 = scmp.lt.s32.totalorder %s1203_s6, %s1253_s4 }
 0x111   : > { %p980_p10 = scmp.lt.s32.totalorder %s978_s14, %s974_s11 }
 0x112   : > { %p976_p7 = pnand %p975_p4, %p1088_p5 }
 0x113   : > { %p981_p11 = por %p980_p10, %p979_p9 }
 0x114   : > { %p977_p8 = pneg %p976_p7 }
 0x116   : > { %p982_p12 = pnand %p981_p11, %p977_p8 }
 0x118   : > { %985 = shalt.err (!%p982_p12)
}
 0x119   : > { %s1023_s23 = smov 64   ;;  %s1024_s27 = smov 4  }
 0x11a   : > { %900 = dma.vmem_to_hbm [thread:$0]  (%p1088_p5), %s1205_s29, 512, %s1203_s6, %s1209_s7, %s1023_s23, %s1023_s23, %s1024_s27  }
 0x11b PF: > { %p906_p13 = scmp.ge.s32.totalorder %s1020_s18, 2  ;;  %s698_s28 = sand.u32 1, %s1008_s15  }
 0x11c   : > { %s699_s30 = scalar_lea.sflag [#allocation3], %s698_s28 }
 0x11d   : > { %p903_p0 = pnand %p906_p13, %p1092_p6 }
 0x11f   : > { %p904_p1 = pneg %p903_p0 }
 0x121   : > { %1003 = dma.done.wait (%p904_p1), %s699_s30, 512  }
 0x122   : > { %1005 = vsyncadd (%p904_p1), %s699_s30, 4294966784  ;;  %p14_p2 = scmp.ge.s32.totalorder %s1075_s21, 4   ;;  %s1256_s15 = smov %s1012_s16 }
 0x123   : > { %s1257_s16 = smov %s1016_s17  ;;  %s1258_s17 = smov %s1086_s24 }
 0x124   : > { %s1259_s18 = smov %s1075_s21  ;;  %16 = sbr.rel (!%p14_p2) target bundleno = 3 (0x3), region = 71 }
 0x129   :  { %704 = vsyncpa [#allocation3], 1 }
 0x12a   :  { %706 = vsyncpa [#allocation3 + $0x1], 1 }

</bundles_post_ra>
